<compile_context>
chip_gen: v6e
topology: v6e:2x2x1
jax: 0.10.0
libtpu: 0.0.40
codegen_flags: <defaults>
</compile_context>

<pallas_src>
import functools

import jax
import jax.numpy as jnp
import numpy as np
from jax.experimental import pallas as pl
from jax.experimental.pallas import tpu as pltpu


# ---------------------------------------------------------------------------
# Kernel
# ---------------------------------------------------------------------------
def _dwconv_kernel(x_ref, top_ref, bot_ref, w_ref, b_ref, o_ref,
                   *, th, w_dim, c_dim):
    """One (1, th, W, C) output row-strip of a depthwise 3x3 conv + bias."""
    h = pl.program_id(1)
    nh = pl.num_programs(1)

    # --- H-extended strip, upcast to f32 exactly once (hoisted) -------------
    top_mask = (h > 0).astype(jnp.float32)          # zero-pad above first strip
    bot_mask = (h < nh - 1).astype(jnp.float32)     # zero-pad below last strip
    top = top_ref[...].astype(jnp.float32) * top_mask            # (1, 1, W, C)
    bot = bot_ref[...].astype(jnp.float32) * bot_mask            # (1, 1, W, C)
    mid = x_ref[...].astype(jnp.float32)                         # (1, th, W, C)
    xe = jnp.concatenate([top, mid, bot], axis=1)                # (1, th+2, W, C)

    # --- masks fixing the two wrapped border columns after the W rolls ------
    col = jax.lax.broadcasted_iota(jnp.int32, (1, 1, w_dim, c_dim), 2)
    not_first = col > 0                  # kills the wrapped column at x == 0
    not_last = col < (w_dim - 1)         # kills the wrapped column at x == W-1

    # --- hoisted per-tap weights / bias (nine (1,1,1,C) broadcast vregs) ----
    wgt = w_ref[...].astype(jnp.float32)                          # (9, C)
    taps = [wgt[k:k + 1, :].reshape(1, 1, 1, c_dim) for k in range(9)]
    bias = b_ref[...].astype(jnp.float32).reshape(1, 1, 1, c_dim)

    # --- 9-tap accumulate in f32 ---------------------------------------------
    acc = jnp.zeros((1, th, w_dim, c_dim), jnp.float32)
    for dx in range(3):
        if dx == 0:
            # tap at x-1: rotate right by one column, zero the wrapped col 0
            xs = jnp.where(not_first, pltpu.roll(xe, shift=1 % w_dim, axis=2), 0.0)
        elif dx == 2:
            # tap at x+1: rotate left by one column, zero the wrapped col W-1
            xs = jnp.where(not_last,
                           pltpu.roll(xe, shift=(w_dim - 1) % w_dim, axis=2), 0.0)
        else:
            # center tap: the aligned strip itself
            xs = xe
        for dy in range(3):
            # H shift: slice along the untiled row axis (free, no relayout)
            acc = acc + xs[:, dy:dy + th, :, :] * taps[dy * 3 + dx]

    o_ref[...] = (acc + bias).astype(o_ref.dtype)


# ---------------------------------------------------------------------------
# VMEM-budget-driven tile selection
# ---------------------------------------------------------------------------
def _vmem_budget_and_limit():
    cap = 64 * 1024 * 1024            # conservative fallback (v7x has 64 MiB/TC)
    try:
        cap = int(pltpu.get_tpu_info().vmem_capacity_bytes)
    except Exception:
        pass
    budget = int(cap * 0.55)          # working-set cap used by the tile picker
    limit = int(cap * 0.70)           # scoped VMEM limit handed to Mosaic
    return budget, limit


def _estimate_vmem_bytes(th, w, c, dtype_bytes):
    strip = th * w * c
    halo = 2 * w * c
    # double-buffered input/output strips + halo rows (input dtype)
    pipelined = dtype_bytes * (2 * strip + 2 * strip + 2 * halo)
    # in-kernel f32 working set: extended strip + one shifted slab + accumulator
    working = 4 * (2 * (th + 2) * w * c + strip)
    return pipelined + working


def _pick_tile_h(h, w, c, dtype_bytes, budget_bytes):
    best = 1
    for th in range(1, h + 1):
        if h % th == 0 and _estimate_vmem_bytes(th, w, c, dtype_bytes) <= budget_bytes:
            best = th                 # largest divisor of H that fits the budget
    return best


# ---------------------------------------------------------------------------
# NHWC entry point (preferred: no layout transposes around the kernel)
# ---------------------------------------------------------------------------
def dwconv_nhwc(x, w9c, b1c, *, tile_h=None):
    """x: (N, H, W, C) NHWC; w9c: (9, C) taps ordered (dy*3+dx, c); b1c: (1, C)."""
    n, h_dim, w_dim, c_dim = x.shape
    budget, vmem_limit = _vmem_budget_and_limit()
    th = tile_h if tile_h is not None else _pick_tile_h(
        h_dim, w_dim, c_dim, x.dtype.itemsize, budget)
    if h_dim % th:
        raise ValueError(f"tile_h={th} must divide H={h_dim}")
    nh = h_dim // th

    kern = functools.partial(_dwconv_kernel, th=th, w_dim=w_dim, c_dim=c_dim)
    return pl.pallas_call(
        kern,
        out_shape=jax.ShapeDtypeStruct((n, h_dim, w_dim, c_dim), x.dtype),
        grid_spec=pltpu.PrefetchScalarGridSpec(
            num_scalar_prefetch=0,
            grid=(n, nh),
            in_specs=[
                # main row strip
                pl.BlockSpec((1, th, w_dim, c_dim),
                             lambda i, j: (i, j, 0, 0)),
                # top halo row (clamped at the border; masked to zero in-kernel)
                pl.BlockSpec((1, 1, w_dim, c_dim),
                             lambda i, j: (i, jnp.maximum(j * th - 1, 0), 0, 0)),
                # bottom halo row (clamped at the border; masked to zero in-kernel)
                pl.BlockSpec((1, 1, w_dim, c_dim),
                             lambda i, j: (i, jnp.minimum((j + 1) * th, h_dim - 1), 0, 0)),
                # 3x3 depthwise taps, channels on lanes
                pl.BlockSpec((9, c_dim), lambda i, j: (0, 0)),
                # bias
                pl.BlockSpec((1, c_dim), lambda i, j: (0, 0)),
            ],
            out_specs=pl.BlockSpec((1, th, w_dim, c_dim),
                                   lambda i, j: (i, j, 0, 0)),
        ),
        compiler_params=pltpu.CompilerParams(
            dimension_semantics=("parallel", "parallel"),
            vmem_limit_bytes=vmem_limit),
    )(x, x, x, w9c, b1c)


# ---------------------------------------------------------------------------
# NCHW wrapper (PyTorch-equivalent API).  Prefer dwconv_nhwc in NHWC networks:
# the two transposes below are extra full HBM passes executed outside the kernel.
# ---------------------------------------------------------------------------
def dwconv(x_nchw, weight_oihw, bias, *, tile_h=None):
    """x_nchw: (N, C, H, W); weight_oihw: (C, 1, 3, 3); bias: (C,) -> (N, C, H, W)."""
    n, c, h, w = x_nchw.shape
    x = jnp.transpose(x_nchw, (0, 2, 3, 1))                        # -> NHWC
    w9c = jnp.transpose(weight_oihw[:, 0, :, :], (1, 2, 0)).reshape(9, c)
    b1c = bias.reshape(1, c)
    out = dwconv_nhwc(x, w9c, b1c, tile_h=tile_h)
    return jnp.transpose(out, (0, 3, 1, 2))                        # -> NCHW


# ---------------------------------------------------------------------------
# Pure-JAX reference mirroring the PyTorch module (NCHW, OIHW)
# ---------------------------------------------------------------------------
def dwconv_ref(x, w, b):
    dn = ("NCHW", "OIHW", "NCHW")
    y = jax.lax.conv_general_dilated(x, w, (1, 1), ((1, 1), (1, 1)),
                                     dimension_numbers=dn,
                                     feature_group_count=w.shape[0])
    return y + b[None, :, None, None]


if __name__ == "__main__":
    # Small but lane-dense shapes: channels = 128 (one full lane width).
    N, C, H, W = 2, 128, 16, 16

    key = jax.random.PRNGKey(0)
    kx, kw, kb = jax.random.split(key, 3)
    x = jax.random.normal(kx, (N, C, H, W), jnp.float32)
    weight = 0.1 * jax.random.normal(kw, (C, 1, 3, 3), jnp.float32)
    bias = 0.1 * jax.random.normal(kb, (C,), jnp.float32)

    # tile_h=8 -> two row strips per image, so the halo/masking path is exercised.
    fn = jax.jit(functools.partial(dwconv, tile_h=8))
    out = jax.block_until_ready(fn(x, weight, bias))

    ref = dwconv_ref(x, weight, bias)
    np.testing.assert_allclose(np.asarray(out), np.asarray(ref),
                               rtol=1e-4, atol=1e-4)
    print("KERNEL_OK")
</pallas_src>

<mosaic_0001>
module attributes {stable_mosaic.version = 11 : i64} {
  func.func @_dwconv_kernel(%arg0: i32, %arg1: i32, %arg2: memref<1x8x16x128xf32, #tpu.memory_space<vmem>>, %arg3: memref<1x1x16x128xf32, #tpu.memory_space<vmem>>, %arg4: memref<1x1x16x128xf32, #tpu.memory_space<vmem>>, %arg5: memref<9x128xf32, #tpu.memory_space<vmem>>, %arg6: memref<1x128xf32, #tpu.memory_space<vmem>>, %arg7: memref<1x8x16x128xf32, #tpu.memory_space<vmem>>) attributes {dimension_semantics = [#tpu.dimension_semantics<parallel>, #tpu.dimension_semantics<parallel>], iteration_bounds = array<i64: 2, 2>, scalar_prefetch = 0 : i64, scratch_operands = 0 : i64, tpu.core_type = #tpu.core_type<tc>, window_params = [{transform_indices = @transform_0, window_bounds = array<i64: 1, 8, 16, 128>}, {transform_indices = @transform_1, window_bounds = array<i64: 1, 1, 16, 128>}, {transform_indices = @transform_2, window_bounds = array<i64: 1, 1, 16, 128>}, {pipeline_mode = #tpu.pipeline_mode<synchronous>, transform_indices = @transform_3, window_bounds = array<i64: 9, 128>}, {pipeline_mode = #tpu.pipeline_mode<synchronous>, transform_indices = @transform_4, window_bounds = array<i64: 1, 128>}, {transform_indices = @transform_5, window_bounds = array<i64: 1, 8, 16, 128>}]} {
    %c0_i32 = arith.constant 0 : i32
    %0 = arith.cmpi sgt, %arg1, %c0_i32 : i32
    %1 = arith.extui %0 : i1 to i32
    %2 = arith.sitofp %1 : i32 to f32
    %c1_i32 = arith.constant 1 : i32
    %3 = arith.cmpi slt, %arg1, %c1_i32 : i32
    %4 = arith.extui %3 : i1 to i32
    %5 = arith.sitofp %4 : i32 to f32
    %c0 = arith.constant 0 : index
    %c0_0 = arith.constant 0 : index
    %c0_1 = arith.constant 0 : index
    %c0_2 = arith.constant 0 : index
    %6 = vector.load %arg3[%c0, %c0_0, %c0_1, %c0_2] : memref<1x1x16x128xf32, #tpu.memory_space<vmem>>, vector<1x1x16x128xf32>
    %7 = vector.broadcast %2 : f32 to vector<1x1x16x128xf32>
    %8 = arith.mulf %6, %7 : vector<1x1x16x128xf32>
    %c0_3 = arith.constant 0 : index
    %c0_4 = arith.constant 0 : index
    %c0_5 = arith.constant 0 : index
    %c0_6 = arith.constant 0 : index
    %9 = vector.load %arg4[%c0_3, %c0_4, %c0_5, %c0_6] : memref<1x1x16x128xf32, #tpu.memory_space<vmem>>, vector<1x1x16x128xf32>
    %10 = vector.broadcast %5 : f32 to vector<1x1x16x128xf32>
    %11 = arith.mulf %9, %10 : vector<1x1x16x128xf32>
    %c0_7 = arith.constant 0 : index
    %c0_8 = arith.constant 0 : index
    %c0_9 = arith.constant 0 : index
    %c0_10 = arith.constant 0 : index
    %12 = vector.load %arg2[%c0_7, %c0_8, %c0_9, %c0_10] : memref<1x8x16x128xf32, #tpu.memory_space<vmem>>, vector<1x8x16x128xf32>
    %13 = tpu.concatenate %8, %12, %11 in 1 : vector<1x1x16x128xf32>, vector<1x8x16x128xf32>, vector<1x1x16x128xf32> -> vector<1x10x16x128xf32>
    %14 = tpu.iota {dimensions = array<i32: 2>} : vector<1x1x16x128xi32>
    %c0_i32_11 = arith.constant 0 : i32
    %15 = vector.broadcast %c0_i32_11 : i32 to vector<1x1x16x128xi32>
    %16 = arith.cmpi sgt, %14, %15 : vector<1x1x16x128xi32>
    %c15_i32 = arith.constant 15 : i32
    %17 = vector.broadcast %c15_i32 : i32 to vector<1x1x16x128xi32>
    %18 = arith.cmpi slt, %14, %17 : vector<1x1x16x128xi32>
    %c0_12 = arith.constant 0 : index
    %c0_13 = arith.constant 0 : index
    %19 = vector.load %arg5[%c0_12, %c0_13] : memref<9x128xf32, #tpu.memory_space<vmem>>, vector<9x128xf32>
    %20 = vector.extract_strided_slice %19 {offsets = [0, 0], sizes = [1, 128], strides = [1, 1]} : vector<9x128xf32> to vector<1x128xf32>
    %21 = vector.shape_cast %20 : vector<1x128xf32> to vector<1x1x1x128xf32>
    %22 = vector.extract_strided_slice %19 {offsets = [1, 0], sizes = [1, 128], strides = [1, 1]} : vector<9x128xf32> to vector<1x128xf32>
    %23 = vector.shape_cast %22 : vector<1x128xf32> to vector<1x1x1x128xf32>
    %24 = vector.extract_strided_slice %19 {offsets = [2, 0], sizes = [1, 128], strides = [1, 1]} : vector<9x128xf32> to vector<1x128xf32>
    %25 = vector.shape_cast %24 : vector<1x128xf32> to vector<1x1x1x128xf32>
    %26 = vector.extract_strided_slice %19 {offsets = [3, 0], sizes = [1, 128], strides = [1, 1]} : vector<9x128xf32> to vector<1x128xf32>
    %27 = vector.shape_cast %26 : vector<1x128xf32> to vector<1x1x1x128xf32>
    %28 = vector.extract_strided_slice %19 {offsets = [4, 0], sizes = [1, 128], strides = [1, 1]} : vector<9x128xf32> to vector<1x128xf32>
    %29 = vector.shape_cast %28 : vector<1x128xf32> to vector<1x1x1x128xf32>
    %30 = vector.extract_strided_slice %19 {offsets = [5, 0], sizes = [1, 128], strides = [1, 1]} : vector<9x128xf32> to vector<1x128xf32>
    %31 = vector.shape_cast %30 : vector<1x128xf32> to vector<1x1x1x128xf32>
    %32 = vector.extract_strided_slice %19 {offsets = [6, 0], sizes = [1, 128], strides = [1, 1]} : vector<9x128xf32> to vector<1x128xf32>
    %33 = vector.shape_cast %32 : vector<1x128xf32> to vector<1x1x1x128xf32>
    %34 = vector.extract_strided_slice %19 {offsets = [7, 0], sizes = [1, 128], strides = [1, 1]} : vector<9x128xf32> to vector<1x128xf32>
    %35 = vector.shape_cast %34 : vector<1x128xf32> to vector<1x1x1x128xf32>
    %36 = vector.extract_strided_slice %19 {offsets = [8, 0], sizes = [1, 128], strides = [1, 1]} : vector<9x128xf32> to vector<1x128xf32>
    %37 = vector.shape_cast %36 : vector<1x128xf32> to vector<1x1x1x128xf32>
    %c0_14 = arith.constant 0 : index
    %c0_15 = arith.constant 0 : index
    %38 = vector.load %arg6[%c0_14, %c0_15] : memref<1x128xf32, #tpu.memory_space<vmem>>, vector<1x128xf32>
    %39 = vector.shape_cast %38 : vector<1x128xf32> to vector<1x1x1x128xf32>
    %cst = arith.constant 0.000000e+00 : f32
    %40 = vector.broadcast %cst : f32 to vector<1x8x16x128xf32>
    %c1_i32_16 = arith.constant 1 : i32
    %41 = tpu.dynamic_rotate %13 by %c1_i32_16 dim 2 : vector<1x10x16x128xf32>, i32 -> vector<1x10x16x128xf32>
    %cst_17 = arith.constant 0.000000e+00 : f32
    %42 = vector.shape_cast %16 : vector<1x1x16x128xi1> to vector<1x1x16x128xi1>
    %43 = vector.broadcast %42 : vector<1x1x16x128xi1> to vector<1x10x16x128xi1>
    %44 = vector.broadcast %cst_17 : f32 to vector<1x10x16x128xf32>
    %45 = arith.select %43, %41, %44 : vector<1x10x16x128xi1>, vector<1x10x16x128xf32>
    %46 = vector.extract_strided_slice %45 {offsets = [0, 0, 0, 0], sizes = [1, 8, 16, 128], strides = [1, 1, 1, 1]} : vector<1x10x16x128xf32> to vector<1x8x16x128xf32>
    %47 = vector.broadcast %21 : vector<1x1x1x128xf32> to vector<1x8x16x128xf32>
    %48 = arith.mulf %46, %47 : vector<1x8x16x128xf32>
    %49 = arith.addf %40, %48 : vector<1x8x16x128xf32>
    %50 = vector.extract_strided_slice %45 {offsets = [0, 1, 0, 0], sizes = [1, 8, 16, 128], strides = [1, 1, 1, 1]} : vector<1x10x16x128xf32> to vector<1x8x16x128xf32>
    %51 = vector.broadcast %27 : vector<1x1x1x128xf32> to vector<1x8x16x128xf32>
    %52 = arith.mulf %50, %51 : vector<1x8x16x128xf32>
    %53 = arith.addf %49, %52 : vector<1x8x16x128xf32>
    %54 = vector.extract_strided_slice %45 {offsets = [0, 2, 0, 0], sizes = [1, 8, 16, 128], strides = [1, 1, 1, 1]} : vector<1x10x16x128xf32> to vector<1x8x16x128xf32>
    %55 = vector.broadcast %33 : vector<1x1x1x128xf32> to vector<1x8x16x128xf32>
    %56 = arith.mulf %54, %55 : vector<1x8x16x128xf32>
    %57 = arith.addf %53, %56 : vector<1x8x16x128xf32>
    %58 = vector.extract_strided_slice %13 {offsets = [0, 0, 0, 0], sizes = [1, 8, 16, 128], strides = [1, 1, 1, 1]} : vector<1x10x16x128xf32> to vector<1x8x16x128xf32>
    %59 = vector.broadcast %23 : vector<1x1x1x128xf32> to vector<1x8x16x128xf32>
    %60 = arith.mulf %58, %59 : vector<1x8x16x128xf32>
    %61 = arith.addf %57, %60 : vector<1x8x16x128xf32>
    %62 = vector.extract_strided_slice %13 {offsets = [0, 1, 0, 0], sizes = [1, 8, 16, 128], strides = [1, 1, 1, 1]} : vector<1x10x16x128xf32> to vector<1x8x16x128xf32>
    %63 = vector.broadcast %29 : vector<1x1x1x128xf32> to vector<1x8x16x128xf32>
    %64 = arith.mulf %62, %63 : vector<1x8x16x128xf32>
    %65 = arith.addf %61, %64 : vector<1x8x16x128xf32>
    %66 = vector.extract_strided_slice %13 {offsets = [0, 2, 0, 0], sizes = [1, 8, 16, 128], strides = [1, 1, 1, 1]} : vector<1x10x16x128xf32> to vector<1x8x16x128xf32>
    %67 = vector.broadcast %35 : vector<1x1x1x128xf32> to vector<1x8x16x128xf32>
    %68 = arith.mulf %66, %67 : vector<1x8x16x128xf32>
    %69 = arith.addf %65, %68 : vector<1x8x16x128xf32>
    %c15_i32_18 = arith.constant 15 : i32
    %70 = tpu.dynamic_rotate %13 by %c15_i32_18 dim 2 : vector<1x10x16x128xf32>, i32 -> vector<1x10x16x128xf32>
    %cst_19 = arith.constant 0.000000e+00 : f32
    %71 = vector.shape_cast %18 : vector<1x1x16x128xi1> to vector<1x1x16x128xi1>
    %72 = vector.broadcast %71 : vector<1x1x16x128xi1> to vector<1x10x16x128xi1>
    %73 = vector.broadcast %cst_19 : f32 to vector<1x10x16x128xf32>
    %74 = arith.select %72, %70, %73 : vector<1x10x16x128xi1>, vector<1x10x16x128xf32>
    %75 = vector.extract_strided_slice %74 {offsets = [0, 0, 0, 0], sizes = [1, 8, 16, 128], strides = [1, 1, 1, 1]} : vector<1x10x16x128xf32> to vector<1x8x16x128xf32>
    %76 = vector.broadcast %25 : vector<1x1x1x128xf32> to vector<1x8x16x128xf32>
    %77 = arith.mulf %75, %76 : vector<1x8x16x128xf32>
    %78 = arith.addf %69, %77 : vector<1x8x16x128xf32>
    %79 = vector.extract_strided_slice %74 {offsets = [0, 1, 0, 0], sizes = [1, 8, 16, 128], strides = [1, 1, 1, 1]} : vector<1x10x16x128xf32> to vector<1x8x16x128xf32>
    %80 = vector.broadcast %31 : vector<1x1x1x128xf32> to vector<1x8x16x128xf32>
    %81 = arith.mulf %79, %80 : vector<1x8x16x128xf32>
    %82 = arith.addf %78, %81 : vector<1x8x16x128xf32>
    %83 = vector.extract_strided_slice %74 {offsets = [0, 2, 0, 0], sizes = [1, 8, 16, 128], strides = [1, 1, 1, 1]} : vector<1x10x16x128xf32> to vector<1x8x16x128xf32>
    %84 = vector.broadcast %37 : vector<1x1x1x128xf32> to vector<1x8x16x128xf32>
    %85 = arith.mulf %83, %84 : vector<1x8x16x128xf32>
    %86 = arith.addf %82, %85 : vector<1x8x16x128xf32>
    %87 = vector.broadcast %39 : vector<1x1x1x128xf32> to vector<1x8x16x128xf32>
    %88 = arith.addf %86, %87 : vector<1x8x16x128xf32>
    %c0_20 = arith.constant 0 : index
    %c0_21 = arith.constant 0 : index
    %c0_22 = arith.constant 0 : index
    %c0_23 = arith.constant 0 : index
    %89 = vector.load %arg7[%c0_20, %c0_21, %c0_22, %c0_23] : memref<1x8x16x128xf32, #tpu.memory_space<vmem>>, vector<1x8x16x128xf32>
    tpu.vector_store %arg7[%c0_20, %c0_21, %c0_22, %c0_23], %88 {strides = array<i32>} : memref<1x8x16x128xf32, #tpu.memory_space<vmem>>, vector<1x8x16x128xf32>,
    return
  }
  func.func @transform_0(%arg0: i32, %arg1: i32) -> (i32, i32, i32, i32) {
    %c0_i32 = arith.constant 0 : i32
    %c0_i32_0 = arith.constant 0 : i32
    %c0_i32_1 = arith.constant 0 : i32
    return %arg0, %arg1, %c0_i32, %c0_i32_0 : i32, i32, i32, i32
  }
  func.func @transform_1(%arg0: i32, %arg1: i32) -> (i32, i32, i32, i32) {
    %c8_i32 = arith.constant 8 : i32
    %0 = arith.muli %arg1, %c8_i32 : i32
    %c1_i32 = arith.constant 1 : i32
    %1 = arith.subi %0, %c1_i32 : i32
    %c0_i32 = arith.constant 0 : i32
    %2 = arith.maxsi %1, %c0_i32 : i32
    %c0_i32_0 = arith.constant 0 : i32
    %c0_i32_1 = arith.constant 0 : i32
    %c0_i32_2 = arith.constant 0 : i32
    return %arg0, %2, %c0_i32_0, %c0_i32_1 : i32, i32, i32, i32
  }
  func.func @transform_2(%arg0: i32, %arg1: i32) -> (i32, i32, i32, i32) {
    %c1_i32 = arith.constant 1 : i32
    %0 = arith.addi %arg1, %c1_i32 : i32
    %c8_i32 = arith.constant 8 : i32
    %1 = arith.muli %0, %c8_i32 : i32
    %c15_i32 = arith.constant 15 : i32
    %2 = arith.minsi %1, %c15_i32 : i32
    %c0_i32 = arith.constant 0 : i32
    %c0_i32_0 = arith.constant 0 : i32
    %c0_i32_1 = arith.constant 0 : i32
    return %arg0, %2, %c0_i32, %c0_i32_0 : i32, i32, i32, i32
  }
  func.func @transform_3(%arg0: i32, %arg1: i32) -> (i32, i32) {
    %c0_i32 = arith.constant 0 : i32
    %c0_i32_0 = arith.constant 0 : i32
    %c0_i32_1 = arith.constant 0 : i32
    return %c0_i32, %c0_i32_0 : i32, i32
  }
  func.func @transform_4(%arg0: i32, %arg1: i32) -> (i32, i32) {
    %c0_i32 = arith.constant 0 : i32
    %c0_i32_0 = arith.constant 0 : i32
    %c0_i32_1 = arith.constant 0 : i32
    return %c0_i32, %c0_i32_0 : i32, i32
  }
  func.func @transform_5(%arg0: i32, %arg1: i32) -> (i32, i32, i32, i32) {
    %c0_i32 = arith.constant 0 : i32
    %c0_i32_0 = arith.constant 0 : i32
    %c0_i32_1 = arith.constant 0 : i32
    return %arg0, %arg1, %c0_i32, %c0_i32_0 : i32, i32, i32, i32
  }
}

</mosaic_0001>

<bundles_post_ra>
// kernel: dwconv.1
= control target key start
LH: loop header
LB: loop body
LE: loop exit
PB: predicated region body
PF: predicated region fallthrough
CT: control target
= control target key end

     0   :  { %s2520_s0 = inlined_call_operand.hbm [shape: f32[2,16,16,128], index: 0, kind: input, shape index: {}, may-alias: {0,1,2}]   ;;  %s2521_s1 = inlined_call_operand.hbm [shape: f32[2,16,16,128], index: 1, kind: input, shape index: {}, may-alias: {0,1,2}]   ;;  %s2522_s2 = inlined_call_operand.hbm [shape: f32[2,16,16,128], index: 2, kind: input, shape index: {}, may-alias: {0,1,2}]   ;;  %s2523_s3 = inlined_call_operand.vmem [shape: f32[9,128], index: 3, kind: input, shape index: {}]   ;;  %s2524_s4 = inlined_call_operand.vmem [shape: f32[1,128], index: 4, kind: input, shape index: {}]   ;;  %s2525_s5 = inlined_call_operand.hbm [shape: f32[2,16,16,128], index: 5, kind: output, shape index: {}]  }
   0x1   :  { %2548 = sst [smem:[#allocation26_spill]] %s2520_s0 }
   0x2   :  { %2549 = sst [smem:[#allocation27_spill]] %s2521_s1 }
   0x3   :  { %2550 = sst [smem:[#allocation28_spill]] %s2522_s2 }
   0x4   :  { %2551 = sst [smem:[#allocation29_spill]] %s2523_s3 }
   0x5   :  { %2552 = sst [smem:[#allocation30_spill]] %s2524_s4 }
   0x6   :  { %2553 = sst [smem:[#allocation31_spill]] %s2525_s5 }
   0x7   :  { %10 = vsyncpa [#allocation3], 0 }
   0x8   :  { %12 = vsyncpa [#allocation3 + $0x1], 0 }
   0x9   :  { %13 = vsyncpa [#allocation6], 0 }
   0xa   :  { %15 = vsyncpa [#allocation6 + $0x1], 0 }
   0xb   :  { %16 = vsyncpa [#allocation4], 0 }
   0xc   :  { %18 = vsyncpa [#allocation4 + $0x1], 0  ;;  %s1535_s18 = smov 0   ;;  %s1537_s19 = smov 0  }
   0xd   :  { %s1539_s20 = smov 0   ;;  %s1541_s21 = smov 0  }
   0xe   :  { %s1543_s22 = smov 0   ;;  %s1545_s23 = smov 0  }
   0xf   :  { %s1547_s24 = smov 0   ;;  %s1549_s25 = smov 0  }
  0x10   :  { %s1551_s26 = smov 0   ;;  %s1553_s27 = smov 0  }
  0x11   :  { %s1555_s28 = smov 0   ;;  %s1557_s29 = smov 0  }
  0x12   :  { %s1559_s30 = smov 0   ;;  %s1561_s6 = smov 0  }
  0x13 LB: > { %2554 = sst [smem:[#allocation13_spill]] %s1459_s22  ;;  %s1606_s7 = sadd.s32 4294967295, %s1495_s6   ;;  %s1495_s6 = sphi %s1561_s6, %s24_s6   ;;  %s1491_s30 = sphi %s1559_s30, %s2611_s30   ;;  %s1487_s29 = sphi %s1557_s29, %s2610_s29   ;;  %s1483_s28 = sphi %s1555_s28, %s2609_s28   ;;  %s1479_s27 = sphi %s1553_s27, %s2608_s27   ;;  %s1475_s26 = sphi %s1551_s26, %s2607_s26   ;;  %s1471_s25 = sphi %s1549_s25, %s2617_s25   ;;  %s1467_s24 = sphi %s1547_s24, %s2616_s24   ;;  %s1463_s23 = sphi %s1545_s23, %s2605_s23   ;;  %s1459_s22 = sphi %s1543_s22, %s2604_s22   ;;  %s1455_s21 = sphi %s1541_s21, %s2603_s21   ;;  %s1451_s20 = sphi %s1539_s20, %s2615_s20   ;;  %s1447_s19 = sphi %s1537_s19, %s2614_s19   ;;  %s1443_s18 = sphi %s1535_s18, %s2613_s18  }
  0x14   : > { %2555 = sst [smem:[#allocation14_spill]] %s1463_s23  ;;  %s33_s8 = sadd.s32 1, %s1487_s29 }
  0x15   : > { %2556 = sst [smem:[#allocation15_spill]] %s1475_s26  ;;  %p34_p0 = scmp.ge.s32.totalorder %s33_s8, 2 }
  0x16   : > { %2557 = sst [smem:[#allocation16_spill]] %s1479_s27  ;;  %s36_s9 = sadd.s32 1, %s1491_s30 }
  0x17   : > { %2558 = sst [smem:[#allocation17_spill]] %s1483_s28  ;;  %p2544_p1 = scmp.eq.s32.totalorder %s1495_s6, 0 }
  0x18   : > { %2559 = sst [smem:[#allocation18_spill]] %s1487_s29  ;;  %p2536_p2 = scmp.eq.s32.totalorder %s1606_s7, 0 }
  0x19   : > { %2560 = sst [smem:[#allocation19_spill]] %s1491_s30  ;;  %s2619_s8 = smov (%p34_p0, %s33_s8), 0 }
  0x1a   : > { %2561 = sst [smem:[#allocation20_spill]] %s2619_s8  ;;  %s2621_s9 = smov (!%p34_p0, %s36_s9), %s1491_s30 }
  0x1b   : > { %s41_s10 = ssub.s32 %s1487_s29, %s2619_s8  ;;  %s1073_s11 = sshll.u32 %s1487_s29, 3 }
  0x1c   : > { %p38_p3 = scmp.ge.s32.totalorder %s2621_s9, 2  ;;  %s1074_s12 = sadd.s32 4294967295, %s1073_s11 }
  0x1d   : > { %p70_p4 = scmp.gt.s32.totalorder %s1074_s12, 0  ;;  %s1075_s13 = sshll.u32 %s2619_s8, 3 }
  0x1e   : > { %s2623_s9 = smov (%p38_p3, %s2621_s9), 0  ;;  %s1076_s15 = sadd.s32 4294967295, %s1075_s13 }
  0x1f   : > { %2562 = sst [smem:[#allocation21_spill]] %s2623_s9  ;;  %s2625_s12 = smov (!%p70_p4, %s1074_s12), 0 }
  0x20   : > { %s1623_s14 = ssub.s32 %s1491_s30, %s2623_s9  ;;  %p74_p5 = scmp.gt.s32.totalorder %s1076_s15, 0 }
  0x21   : > { %2563 = sst [smem:[#allocation22_spill]] %s1623_s14  ;;  %s1626_s16 = sor.u32 %s41_s10, %s1623_s14 }
  0x22   : > { %p43_p6 = scmp.eq.s32.totalorder %s1626_s16, 0  ;;  %s81_s17 = sadd.s32 1, %s1463_s23 }
  0x23   : > { %s2627_s15 = smov (!%p74_p5, %s1076_s15), 0  ;;  %p88_p7 = scmp.ne.s32.totalorder %s1463_s23, %s1459_s22 }
  0x24   : > { %p94_p8 = scmp.ne.s32.totalorder %s1459_s22, %s1455_s21  ;;  %s77_s8 = ssub.s32 %s2625_s12, %s2627_s15 }
  0x25   : > { %s1634_s9 = sadd.s32 8, %s1073_s11  ;;  %s78_s5 = sor.u32 %s77_s8, %s1623_s14 }
  0x26   : > { %p1639_p9 = por %p88_p7, %p2544_p1  ;;  %p79_p10 = scmp.eq.s32.totalorder %s78_s5, 0 }
  0x27   : > { %p1645_p11 = por %p94_p8, %p2536_p2  ;;  %s1650_s21 = sadd.s32 8, %s1075_s13 }
  0x28   : > { %s1653_s11 = scalar_select %p79_p10, %s1463_s23, %s81_s17  }
  0x29   : > { %s2565_s28 = scalar_select %p1645_p11, 1, 0 }
  0x2a   : > { %2567 = sst [smem:[#allocation24_spill]] %s1653_s11  ;;  %p2535_p0 = scmp.lt.s32.totalorder %s1495_s6, 4 }
  0x2b   : > { %2566 = sst [smem:[#allocation23_spill]] %s2565_s28  ;;  %s1658_s8 = sshll.u32 %s1491_s30, 5 }
  0x2c   : > { %s254_s5 = sand.u32 1, %s1495_s6   ;;  %s256_s15 = sand.u32 1, %s1463_s23  }
  0x2d   : > { %s1086_s4 = sshll.u32 %s256_s15, 4  ;;  %s1089_s3 = sshll.u32 %s2625_s12, 1 }
  0x2e   : > { %s268_s27 = sadd.s32 %s1089_s3, %s1658_s8  ;;  %s258_s28 = scalar_lea.vmem [#allocation5], %s1086_s4 }
  0x2f   : > { %s271_s22 = sshll.u32 %s258_s28, 4  ;;  %s1091_s2 = sshll.u32 %s268_s27, 7  ;;  %s272_s22 = int_to_ptr.vmem [resolvable:$true] %s271_s22 }
  0x30   : > { %s2568_s1 = sld [smem:[#allocation27_spill]]  ;;  %p1670_p3 = pnand %p2535_p0, %p1639_p9 }
  0x31   : > { %p1097_p4 = scmp.ge.s32.totalorder %s1495_s6, 1  ;;  %p306_p5 = scmp.lt.s32.totalorder %s1495_s6, 5 }
  0x32   : > { %s1676_s15 = scalar_lea.sflag [#allocation6], %s254_s5  ;;  %p1261_p7 = pneg %p1670_p3 }
  0x33   : > { %s1272_s3 = scalar_lea.vmem %s272_s22, 256  ;;  %s1497_s4 = smov [#allocation5]  }
  0x34   : > { %p1273_p8 = scmp.ne.s32.totalorder %s272_s22, %s1272_s3  ;;  %s1277_s27 = sshll.u32 %s1497_s4, 4  ;;  %s1278_s27 = int_to_ptr.vmem [resolvable:$false] %s1277_s27 }
  0x35   : > { %p1280_p12 = scmp.lt.s32.totalorder %s272_s22, %s1278_s27 }
  0x36   : > { %s270_s17 = scalar_lea.hbm %s2568_s1, %s1091_s2  ;;  %p1275_p10 = pnand %p1273_p8, %p1261_p7 }
  0x37   : > { %s1279_s2 = scalar_lea.vmem %s1278_s27, 512 }
  0x38   : > { %p1276_p13 = pneg %p1275_p10  ;;  %p1281_p9 = scmp.lt.s32.totalorder %s1279_s2, %s1272_s3 }
  0x3a   : > { %p1282_p0 = por %p1281_p9, %p1280_p12 }
  0x3c   : > { %p1283_p2 = pnand %p1282_p0, %p1276_p13 }
  0x3e   : > { %1286 = shalt.err (!%p1283_p2)
}
  0x3f   : > { %s2537_s28 = smov 128   ;;  %s2539_s12 = smov 8  }
  0x40   : > { %1133 = dma.hbm_to_vmem [thread:$0]  (!%p1670_p3), %s270_s17, 256, %s272_s22, %s1676_s15, %s2537_s28, %s2537_s28, %s2539_s12  }
  0x41   : > { %p1690_p2 = pnand %p1097_p4, %p306_p5  ;;  %s1072_s10 = sadd.s32 4294967294, %s1495_s6  }
  0x42   : > { %s45_s5 = sadd.s32 1, %s1475_s26  ;;  %p52_p12 = scmp.ne.s32.totalorder %s1475_s26, %s1471_s25 }
  0x43   : > { %s1699_s13 = scalar_select %p43_p6, %s1475_s26, %s45_s5  }
  0x44   : > { %p58_p13 = scmp.ne.s32.totalorder %s1471_s25, %s1467_s24  ;;  %p198_p0 = scmp.eq.s32.totalorder %s1606_s7, 3 }
  0x45   : > { %2571 = sst [smem:[#allocation25_spill]] %s1699_s13  ;;  %p204_p7 = scmp.eq.s32.totalorder %s1072_s10, 3 }
  0x46   : > { %p1708_p8 = por %p2544_p1, %p52_p12  ;;  %p2573_p3 = scmp.eq.s32.totalorder %s1606_s7, 0 }
  0x47   : > { %p1718_p5 = por %p198_p0, %p52_p12  ;;  %p1722_p6 = por %p204_p7, %p58_p13 }
  0x48   : > { %p1714_p4 = por %p2573_p3, %p58_p13  ;;  %s230_s3 = sand.u32 1, %s1475_s26  }
  0x49   : > { %s2575_s16 = scalar_select %p1718_p5, 1, 0 }
  0x4a   : > { %s2576_s17 = scalar_select %p1722_p6, 1, 0 }
  0x4b   : > { %s1115_s4 = sshll.u32 %s1487_s29, 4  ;;  %s1081_s27 = sshll.u32 %s230_s3, 7 }
  0x4c   : > { %s241_s2 = sadd.s32 %s1115_s4, %s1658_s8  ;;  %s234_s5 = scalar_lea.vmem [#allocation2], %s1081_s27 }
  0x4d   : > { %s1085_s10 = sshll.u32 %s241_s2, 7  ;;  %s244_s28 = sshll.u32 %s234_s5, 4  ;;  %s245_s28 = int_to_ptr.vmem [resolvable:$true] %s244_s28 }
  0x4e   : > { %s2577_s0 = sld [smem:[#allocation26_spill]]  ;;  %p2578_p10 = scmp.lt.s32.totalorder %s1495_s6, 4 }
  0x4f   : > { %s231_s23 = scalar_lea.sflag [#allocation3], %s230_s3  ;;  %s1300_s29 = scalar_lea.vmem %s245_s28, 2048 }
  0x50   : > { %p1736_p9 = pnand %p2578_p10, %p1708_p8  ;;  %p1301_p13 = scmp.ne.s32.totalorder %s245_s28, %s1300_s29 }
  0x51   : > { %s1500_s4 = smov [#allocation2]  }
  0x52   : > { %p1289_p12 = pneg %p1736_p9  ;;  %s1305_s27 = sshll.u32 %s1500_s4, 4  ;;  %s1306_s27 = int_to_ptr.vmem [resolvable:$false] %s1305_s27 }
  0x53   : > { %s1307_s1 = scalar_lea.vmem %s1306_s27, 4096  ;;  %p1308_p3 = scmp.lt.s32.totalorder %s245_s28, %s1306_s27 }
  0x54   : > { %s243_s30 = scalar_lea.hbm %s2577_s0, %s1085_s10  ;;  %p1303_p0 = pnand %p1301_p13, %p1289_p12 }
  0x55   : > { %p1309_p1 = scmp.lt.s32.totalorder %s1307_s1, %s1300_s29 }
  0x56   : > { %p1304_p7 = pneg %p1303_p0 }
  0x57   : > { %p1310_p6 = por %p1309_p1, %p1308_p3 }
  0x59   : > { %p1311_p5 = pnand %p1310_p6, %p1304_p7 }
  0x5b   : > { %1314 = shalt.err (!%p1311_p5)
}
  0x5c   : > { %s2580_s12 = smov 8   ;;  %s2581_s22 = smov 128  }
  0x5d   : > { %s2582_s3 = sld [smem:[#allocation22_spill]]  ;;  %p2583_p1 = scmp.lt.s32.totalorder %s1634_s9, 15 }
  0x5e   : > { %1130 = dma.hbm_to_vmem [thread:$0]  (!%p1736_p9), %s243_s30, 2048, %s245_s28, %s231_s23, %s2581_s22, %s2581_s22, %s2580_s12  }
  0x5f   : > { %s2629_s9 = smov (!%p2583_p1, %s1634_s9), 15  ;;  %p2584_p8 = scmp.lt.s32.totalorder %s1650_s21, 15 }
  0x60   : > { %s117_s29 = sadd.s32 1, %s1451_s20  ;;  %p124_p5 = scmp.ne.s32.totalorder %s1451_s20, %s1447_s19 }
  0x61   : > { %s2631_s21 = smov (!%p2584_p8, %s1650_s21), 15  ;;  %p130_p6 = scmp.ne.s32.totalorder %s1447_s19, %s1443_s18 }
  0x62   : > { %s113_s13 = ssub.s32 %s2629_s9, %s2631_s21  ;;  %p2585_p10 = scmp.eq.s32.totalorder %s1495_s6, 0 }
  0x63   : > { %s114_s2 = sor.u32 %s113_s13, %s2582_s3  ;;  %p2587_p0 = scmp.eq.s32.totalorder %s1606_s7, 0 }
  0x64   : > { %p1761_p12 = por %p124_p5, %p2585_p10  ;;  %p115_p13 = scmp.eq.s32.totalorder %s114_s2, 0 }
  0x65   : > { %p1767_p7 = por %p130_p6, %p2587_p0  ;;  %s283_s30 = sand.u32 1, %s1451_s20  }
  0x66   : > { %s1094_s28 = sshll.u32 %s2629_s9, 1  ;;  %s1092_s21 = sshll.u32 %s283_s30, 4 }
  0x67   : > { %s2588_s23 = scalar_select %p1767_p7, 1, 0 }
  0x68   : > { %s1773_s5 = scalar_select %p115_p13, %s1451_s20, %s117_s29  }
  0x69   : > { %s295_s4 = sadd.s32 %s1094_s28, %s1658_s8  ;;  %s2589_s3 = sld [smem:[#allocation28_spill]] }
  0x6a   : > { %s1096_s18 = sshll.u32 %s295_s4, 7  ;;  %s285_s0 = scalar_lea.vmem [#allocation7], %s1092_s21 }
  0x6b   : > { %s298_s26 = sshll.u32 %s285_s0, 4  ;;  %p2590_p9 = scmp.lt.s32.totalorder %s1495_s6, 4  ;;  %s299_s26 = int_to_ptr.vmem [resolvable:$true] %s298_s26 }
  0x6c   : > { %s1328_s9 = scalar_lea.vmem %s299_s26, 256  ;;  %s1501_s8 = smov [#allocation7]  }
  0x6d   : > { %p1783_p3 = pnand %p2590_p9, %p1761_p12  ;;  %p1329_p8 = scmp.ne.s32.totalorder %s299_s26, %s1328_s9 }
  0x6e   : > { %s1333_s29 = sshll.u32 %s1501_s8, 4  ;;  %s1334_s29 = int_to_ptr.vmem [resolvable:$false] %s1333_s29 }
  0x6f   : > { %s297_s13 = scalar_lea.hbm %s2589_s3, %s1096_s18  ;;  %p1317_p1 = pneg %p1783_p3 }
  0x70   : > { %s1335_s30 = scalar_lea.vmem %s1334_s29, 512  ;;  %p1336_p10 = scmp.lt.s32.totalorder %s299_s26, %s1334_s29 }
  0x71   : > { %p1331_p5 = pnand %p1329_p8, %p1317_p1  ;;  %p1337_p13 = scmp.lt.s32.totalorder %s1335_s30, %s1328_s9 }
  0x73   : > { %p1332_p6 = pneg %p1331_p5  ;;  %p1338_p0 = por %p1337_p13, %p1336_p10 }
  0x75   : > { %p1339_p7 = pnand %p1338_p0, %p1332_p6 }
  0x77   : > { %1342 = shalt.err (!%p1339_p7)
}
  0x78   : > { %1136 = dma.hbm_to_vmem [thread:$0]  (!%p1783_p3), %s297_s13, 256, %s299_s26, %s1676_s15, %s2581_s22, %s2581_s22, %s2580_s12  }
  0x79   : > { %310 = sbr.rel (%p1690_p2) target bundleno = 272 (0x110), region = 40  ;;  %s1798_s0 = sand.u32 (!%p1690_p2), 1, %s1471_s25  }
  0x7a   : > { %s1098_s10 = sshll.u32 (!%p1690_p2), %s1798_s0, 7  ;;  %s313_s28 = scalar_lea.sflag (!%p1690_p2), [#allocation3], %s1798_s0 }
  0x7b   : > { %s1804_s21 = scalar_lea.vmem (!%p1690_p2), [#allocation2], %s1098_s10 }
  0x7e   : > { %1426 = dma.done.wait (%p1714_p4), %s313_s28, 2048  }
  0x7f   : > { %1428 = vsyncadd (%p1714_p4), %s313_s28, 4294965248  ;;  %s2592_s26 = sld [smem:[#allocation13_spill]]  ;;  %s321_s14 = sand.u32 1, %s1606_s7  }
  0x80   : > { %s322_s4 = scalar_lea.sflag [#allocation6], %s321_s14 }
  0x85   : > { %s323_s12 = sand.u32 1, %s2592_s26  }
  0x86   : > { %s1099_s22 = sshll.u32 %s323_s12, 4 }
  0x87   : > { %s325_s18 = scalar_lea.vmem [#allocation5], %s1099_s22 }
  0x88   : > { %1430 = dma.done.wait (%p1645_p11), %s322_s4, 256  }
  0x89   : > { %1432 = vsyncadd (%p1645_p11), %s322_s4, 4294967040  ;;  %s332_s27 = sand.u32 1, %s1447_s19   ;;  %p2594_p2 = scmp.ne.s32.totalorder %s2588_s23, 0 }
  0x8a   : > { %s1817_s1 = sshll.u32 %s332_s27, 4 }
  0x8b   : > { %s334_s11 = scalar_lea.vmem [#allocation7], %s1817_s1 }
  0x8c   : > { %1434 = dma.done.wait (%p2594_p2), %s322_s4, 256  }
  0x8d   : > { %1436 = vsyncadd (%p2594_p2), %s322_s4, 4294967040  ;;  %s2595_s7 = sld [smem:[#allocation16_spill]]  ;;  %v413_v0 = vlaneseq  ;;  %v387_v4 = vld [vmem:[%s325_s18] sm:$0xff]  ;;  %v388_v5 = vld [vmem:[%s325_s18 + $0x8] sm:$0xff]  ;;  %s2023_s15 = scalar_lea.vmem [#allocation8], %s1098_s10 }
  0x8e   : > { %v1831_v6 = vld [vmem:[%s1804_s21] sm:$0xff]  ;;  %v1841_v12 = vld [vmem:[%s1804_s21 + $0x8] sm:$0xff]  ;;  %v1844_v13 = vld [vmem:[%s1804_s21 + $0x10] sm:$0xff]  ;;  %s2596_s9 = sld [smem:[#allocation29_spill]]  ;;  %s932_s27 = sshll.u32 %s2023_s15, 4  ;;  %s2441_s27 = int_to_ptr.vmem [resolvable:$true] %s932_s27 }
  0x8f   : > { %v1825_v1 = vshrl.u32 %v413_v0, 7  ;;  %v1847_v14 = vld [vmem:[%s1804_s21 + $0x18] sm:$0xff]  ;;  %v424_v15 = vrot.slane %v1831_v6, 7  ;;  %v425_v18 = vrot.slane %v1844_v13, 7  ;;  %v434_v23 = vrot.slane %v1841_v12, 7  ;;  %v1933_v0 = vld [vmem:[%s1804_s21 + $0x20] sm:$0xff] }
  0x90   : > { %v435_v24 = vrot.slane %v1847_v14, 7  ;;  %v705_v43 = vrot.slane %v1831_v6, 1  ;;  %v715_v47 = vrot.slane %v1841_v12, 1  ;;  %v706_v49 = vrot.slane %v1844_v13, 1  ;;  %s2597_s26 = sld [smem:[#allocation30_spill]]  ;;  %s1343_s23 = scalar_lea.vmem %s2441_s27, 2048 }
  0x91   : > { %vm416_vm0 = vcmp.gt.s32.totalorder %v1825_v1, 0  ;;  %vm443_vm1 = vcmp.lt.s32.totalorder %v1825_v1, 1  ;;  %v490_v3 = vsub.s32 0, %v1825_v1  ;;  %v526_v7 = vsub.s32 3, %v1825_v1  ;;  %s2598_s14 = sld [smem:[#allocation17_spill]]  ;;  %p1344_p12 = scmp.ne.s32.totalorder %s2441_s27, %s1343_s23 }
  0x92   : > { %v562_v8 = vsub.s32 6, %v1825_v1  ;;  %v598_v9 = vsub.s32 1, %v1825_v1  ;;  %v634_v16 = vsub.s32 4, %v1825_v1  ;;  %v670_v19 = vsub.s32 7, %v1825_v1  ;;  %p2600_p7 = scmp.ne.s32.totalorder %s2575_s16, 0  ;;  %s1502_s2 = smov [#allocation8]  }
  0x93   : > { %p381_p4 = scmp.gt.s32.totalorder %s2595_s7, 0  ;;  %vm724_vm2 = vcmp.lt.s32.totalorder %v1825_v1, 7  ;;  %v771_v20 = vsub.s32 2, %v1825_v1  ;;  %v807_v28 = vsub.s32 5, %v1825_v1  ;;  %v455_v30 = vsel %vm443_vm1, %v434_v23, %v424_v15  ;;  %p384_p11 = scmp.lt.s32.totalorder %s2595_s7, 1 }
  0x94   : > { %v420_v17 = vld [vmem:[%s2596_s9] sm:$0xff]  ;;  %v456_v31 = vsel %vm443_vm1, %v435_v24, %v425_v18  ;;  %v470_v34 = vsel %vm416_vm0, %v455_v30, 0.0  ;;  %v1892_v40 = vadd.s32 8, %v1825_v1  ;;  %v716_v50 = vrot.slane %v1847_v14, 1  ;;  %v1924_v59 = vld [vmem:[%s2596_s9 + $0x8] ss:$0 sm:$0xff]  ;;  %p1345_p9 = pnand %p1344_p12, %p2600_p7 }
  0x95   : > { %s382_s3 = scalar_select %p381_p4, 1, 0  ;;  %v1862_v25 = vrot.slane %v420_v17, %v490_v3  ;;  %v1864_v26 = vrot.slane %v420_v17, %v526_v7  ;;  %v1866_v27 = vrot.slane %v420_v17, %v562_v8  ;;  %v1875_v32 = vrot.slane %v420_v17, %v598_v9 }
  0x96   : > { %v1883_v35 = vsel %vm416_vm0, %v456_v31, 0.0  ;;  %v1885_v36 = vrot.slane %v420_v17, %v634_v16  ;;  %v1894_v41 = vrot.slane %v420_v17, %v670_v19  ;;  %v1906_v51 = vrot.slane %v420_v17, %v771_v20  ;;  %s2318_s10 = scalar_select %p384_p11, 1, 0 }
  0x97   : > { %s383_s13 = scvt.s32.f32 %s382_s3  ;;  %v528_v38 = vmul.f32 %v1864_v26, %v470_v34  ;;  %v564_v39 = vmul.f32 %v1866_v27, %v1883_v35  ;;  %v1912_v55 = vrot.slane %v420_v17, %v807_v28  ;;  %v726_v56 = vsel %vm724_vm2, %v705_v43, %v715_v47  ;;  %s1118_s12 = sshll.u32 %s2595_s7, 4 }
  0x98   : > { %v636_v48 = vmul.f32 %v1885_v36, %v1831_v6  ;;  %v672_v53 = vmul.f32 %v1894_v41, %v1844_v13  ;;  %vm419_vm3 = vcmp.lt.s32.totalorder %v1892_v40, 15  ;;  %v445_v58 = vsel %vm443_vm1, %v424_v15, %v434_v23  ;;  %v1949_v15 = vld [vmem:[%s1804_s21 + $0x28] sm:$0xff]  ;;  %s1107_s22 = sshll.u32 %s2598_s14, 5  ;;  %s2599_s7 = sld [smem:[#allocation31_spill]] }
  0x99   : > { %v389_v2 = vstv %s383_s13  ;;  %v1928_v61 = vsel %vm443_vm1, %v425_v18, %v435_v24  ;;  %v529_v63 = vmul.f32 %v1864_v26, %v445_v58  ;;  %v809_v16 = vmul.f32 %v1912_v55, %v726_v56  ;;  %s929_s4 = sadd.s32 %s1118_s12, %s1107_s22  ;;  %s916_s13 = scalar_lea.sflag [#allocation4], %s1798_s0 }
  0x9a   : > { %v1836_v10 = vmul.f32 %v389_v2, %v387_v4  ;;  %v1838_v11 = vmul.f32 %v389_v2, %v388_v5  ;;  %v1937_v2 = vsel %vm724_vm2, %v706_v49, %v716_v50  ;;  %v565_v4 = vmul.f32 %v1866_v27, %v1928_v61  ;;  %s1108_s18 = sshll.u32 %s929_s4, 7  ;;  %p1346_p3 = pneg %p1345_p9 }
  0x9b   : > { %v845_v17 = vmul.f32 %v1924_v59, %v1937_v2  ;;  %v737_v18 = vsel %vm724_vm2, %v716_v50, %v706_v49  ;;  %v673_v23 = vmul.f32 %v1894_v41, %v1847_v14  ;;  %v436_v28 = vrot.slane %v1949_v15, 7  ;;  %s1347_s8 = sshll.u32 %s1502_s2, 4  ;;  %s1348_s8 = int_to_ptr.vmem [resolvable:$false] %s1347_s8 }
  0x9c   : > { %v423_v21 = vrot.slane %v1836_v10, 7  ;;  %v433_v22 = vrot.slane %v1838_v11, 7  ;;  %v704_v42 = vrot.slane %v1836_v10, 1  ;;  %v714_v44 = vrot.slane %v1838_v11, 1  ;;  %s1349_s29 = scalar_lea.vmem %s1348_s8, 4096  ;;  %p1350_p1 = scmp.lt.s32.totalorder %s2441_s27, %s1348_s8 }
  0x9d   : > { %v600_v46 = vmul.f32 %v1875_v32, %v1836_v10  ;;  %v601_v5 = vmul.f32 %v1875_v32, %v1838_v11  ;;  %v736_v10 = vsel %vm724_vm2, %v715_v47, %v705_v43  ;;  %v426_v11 = vrot.slane %v1933_v0, 7  ;;  %v1986_v47 = vld [vmem:[%s2597_s26] ss:$0 sm:$0xff]  ;;  %p1351_p8 = scmp.lt.s32.totalorder %s1349_s29, %s1343_s23 }
  0x9e   : > { %v454_v29 = vsel %vm443_vm1, %v433_v22, %v423_v21  ;;  %v725_v54 = vsel %vm724_vm2, %v704_v42, %v714_v44  ;;  %v444_v57 = vsel %vm443_vm1, %v423_v21, %v433_v22  ;;  %v735_v9 = vsel %vm724_vm2, %v714_v44, %v704_v42  ;;  %s2439_s3 = scalar_lea.hbm %s2599_s7, %s1108_s18 }
  0x9f   : > { %v468_v33 = vsel %vm416_vm0, %v454_v29, 0.0  ;;  %v493_v62 = vmul.f32 %v1862_v25, %v444_v57  ;;  %v773_v3 = vmul.f32 %v1906_v51, %v725_v54  ;;  %v637_v21 = vmul.f32 %v1885_v36, %v1841_v12  ;;  %p1352_p5 = por %p1351_p8, %p1350_p1 }
  0xa0   : > { %v492_v37 = vmul.f32 %v1862_v25, %v468_v33  ;;  %v750_v22 = vsel %vm419_vm3, %v735_v9, 0.0  ;;  %v752_v24 = vsel %vm419_vm3, %v736_v10, 0.0  ;;  %v494_v29 = vmul.f32 %v1862_v25, %v470_v34  ;;  %v2010_v9 = vld [vmem:[%s1804_s21 + $0x30] sm:$0xff] }
  0xa1   : > { %v545_v8 = vadd.f32 %v529_v63, %v493_v62  ;;  %v1969_v33 = vsel %vm419_vm3, %v737_v18, 0.0  ;;  %v457_v43 = vsel %vm443_vm1, %v436_v28, %v426_v11  ;;  %v602_v49 = vmul.f32 %v1875_v32, %v1831_v6  ;;  %v2019_v18 = vld [vmem:[%s1804_s21 + $0x38] sm:$0xff]  ;;  %p1353_p6 = pnand %p1352_p5, %p1346_p3 }
  0xa2   : > { %v544_v45 = vadd.f32 %v528_v38, %v492_v37  ;;  %v530_v37 = vmul.f32 %v1864_v26, %v1883_v35  ;;  %v774_v38 = vmul.f32 %v1906_v51, %v750_v22  ;;  %v846_v42 = vmul.f32 %v1924_v59, %v1969_v33 }
  0xa3   : > { %v581_v20 = vadd.f32 %v565_v4, %v545_v8  ;;  %v707_v50 = vrot.slane %v1933_v0, 1  ;;  %v1996_v57 = vsel %vm443_vm1, %v426_v11, %v436_v28  ;;  %v638_v63 = vmul.f32 %v1885_v36, %v1844_v13 }
  0xa4   : > { %v580_v52 = vadd.f32 %v564_v39, %v544_v45  ;;  %v810_v39 = vmul.f32 %v1912_v55, %v752_v24  ;;  %v1981_v45 = vsel %vm416_vm0, %v457_v43, 0.0  ;;  %v531_v6 = vmul.f32 %v1864_v26, %v1928_v61 }
  0xa5   : > { %v617_v31 = vadd.f32 %v601_v5, %v581_v20  ;;  %v775_v8 = vmul.f32 %v1906_v51, %v726_v56  ;;  %v811_v56 = vmul.f32 %v1912_v55, %v1937_v2  ;;  %v639_v20 = vmul.f32 %v1885_v36, %v1847_v14 }
  0xa6   : > { %v616_v60 = vadd.f32 %v600_v46, %v580_v52  ;;  %v546_v46 = vadd.f32 %v530_v37, %v494_v29  ;;  %v717_v52 = vrot.slane %v1949_v15, 1  ;;  %v675_v29 = vmul.f32 %v1894_v41, %v1949_v15 }
  0xa7   : > { %v653_v44 = vadd.f32 %v637_v21, %v617_v31  ;;  %v496_v31 = vmul.f32 %v1862_v25, %v1883_v35  ;;  %v532_v43 = vmul.f32 %v1864_v26, %v1981_v45 }
  0xa8   : > { %v652_v7 = vadd.f32 %v636_v48, %v616_v60  ;;  %v566_v48 = vmul.f32 %v1866_v27, %v1981_v45  ;;  %v495_v60 = vmul.f32 %v1862_v25, %v445_v58  ;;  %v2014_v10 = vsel %vm724_vm2, %v707_v50, %v717_v52 }
  0xa9   : > { %v689_v54 = vadd.f32 %v673_v23, %v653_v44  ;;  %v427_v23 = vrot.slane %v2010_v9, 7  ;;  %v812_v44 = vmul.f32 %v1912_v55, %v1969_v33 }
  0xaa   : > { %v688_v19 = vadd.f32 %v672_v53, %v652_v7  ;;  %v582_v62 = vadd.f32 %v566_v48, %v546_v46  ;;  %v674_v7 = vmul.f32 %v1894_v41, %v1933_v0 }
  0xab   : > { %v790_v5 = vadd.f32 %v774_v38, %v689_v54  ;;  %v640_v54 = vmul.f32 %v1885_v36, %v1933_v0 }
  0xac   : > { %v789_v30 = vadd.f32 %v773_v3, %v688_v19  ;;  %v567_v3 = vmul.f32 %v1866_v27, %v1996_v57  ;;  %v618_v58 = vadd.f32 %v602_v49, %v582_v62  ;;  %v847_v19 = vmul.f32 %v1924_v59, %v2014_v10 }
  0xad   : > { %v826_v11 = vadd.f32 %v810_v39, %v790_v5  ;;  %v776_v39 = vmul.f32 %v1906_v51, %v752_v24  ;;  %v548_v49 = vadd.f32 %v532_v43, %v496_v31  ;;  %v497_v5 = vmul.f32 %v1862_v25, %v1928_v61 }
  0xae   : > { %v825_v34 = vadd.f32 %v809_v16, %v789_v30  ;;  %v547_v16 = vadd.f32 %v531_v6, %v495_v60  ;;  %v654_v21 = vadd.f32 %v638_v63, %v618_v58  ;;  %v437_v30 = vrot.slane %v2019_v18, 7 }
  0xaf   : > { %v862_v28 = vadd.f32 %v846_v42, %v826_v11  ;;  %v708_v63 = vrot.slane %v2010_v9, 1  ;;  %v718_v6 = vrot.slane %v2019_v18, 1  ;;  %v676_v58 = vmul.f32 %v1894_v41, %v2010_v9 }
  0xb0   : > { %v861_v53 = vadd.f32 %v845_v17, %v825_v34  ;;  %v603_v17 = vmul.f32 %v1875_v32, %v1841_v12  ;;  %v583_v22 = vadd.f32 %v567_v3, %v547_v16  ;;  %v738_v12 = vsel %vm724_vm2, %v717_v52, %v707_v50 }
  0xb1   : > { %v690_v37 = vadd.f32 %v674_v7, %v654_v21  ;;  %v884_v34 = vadd.f32 %v1986_v47, %v862_v28  ;;  %v2046_v42 = vsel %vm419_vm3, %v738_v12, 0.0  ;;  %v458_v46 = vsel %vm443_vm1, %v437_v30, %v427_v23 }
  0xb2   : > { %v883_v4 = vadd.f32 %v1986_v47, %v861_v53  ;;  %v619_v38 = vadd.f32 %v603_v17, %v583_v22  ;;  %v2054_v24 = vsel %vm416_vm0, %v458_v46, 0.0  ;;  %v848_v50 = vmul.f32 %v1924_v59, %v2046_v42 }
  0xb3   : > { %v791_v35 = vadd.f32 %v775_v8, %v690_v37  ;;  %900 = vst [vmem:[%s2023_s15 + $0x8] sm:$0xff] %v884_v34  ;;  %v568_v52 = vmul.f32 %v1866_v27, %v2054_v24  ;;  %v604_v53 = vmul.f32 %v1875_v32, %v1844_v13  ;;  %v533_v13 = vmul.f32 %v1864_v26, %v1996_v57 }
  0xb4   : > { %899 = vst [vmem:[%s2023_s15] sm:$0xff] %v883_v4  ;;  %v655_v48 = vadd.f32 %v639_v20, %v619_v38  ;;  %v2069_v4 = vsel %vm443_vm1, %v427_v23, %v437_v30  ;;  %v777_v11 = vmul.f32 %v1906_v51, %v1937_v2  ;;  %v605_v61 = vmul.f32 %v1875_v32, %v1847_v14  ;;  %v2084_v20 = vld [vmem:[%s1804_s21 + $0x40] sm:$0xff]  ;;  %v2094_v23 = vld [vmem:[%s1804_s21 + $0x48] sm:$0xff] }
  0xb5   : > { %v827_v60 = vadd.f32 %v811_v56, %v791_v35  ;;  %v584_v3 = vadd.f32 %v568_v52, %v548_v49  ;;  %v569_v16 = vmul.f32 %v1866_v27, %v2069_v4  ;;  %v549_v56 = vadd.f32 %v533_v13, %v497_v5 }
  0xb6   : > { %v691_v62 = vadd.f32 %v675_v29, %v655_v48  ;;  %v2089_v22 = vsel %vm724_vm2, %v708_v63, %v718_v6  ;;  %v813_v12 = vmul.f32 %v1912_v55, %v2014_v10  ;;  %v641_v29 = vmul.f32 %v1885_v36, %v1949_v15 }
  0xb7   : > { %v863_v7 = vadd.f32 %v847_v19, %v827_v60  ;;  %v620_v17 = vadd.f32 %v604_v53, %v584_v3  ;;  %v585_v2 = vadd.f32 %v569_v16, %v549_v56  ;;  %v739_v14 = vsel %vm724_vm2, %v718_v6, %v708_v63 }
  0xb8   : > { %v792_v8 = vadd.f32 %v776_v39, %v691_v62  ;;  %v849_v31 = vmul.f32 %v1924_v59, %v2089_v22  ;;  %v677_v37 = vmul.f32 %v1894_v41, %v2019_v18  ;;  %v428_v38 = vrot.slane %v2084_v20, 7 }
  0xb9   : > { %v885_v19 = vadd.f32 %v1986_v47, %v863_v7  ;;  %v656_v28 = vadd.f32 %v640_v54, %v620_v17  ;;  %v621_v43 = vadd.f32 %v605_v61, %v585_v2  ;;  %v438_v34 = vrot.slane %v2094_v23, 7 }
  0xba   : > { %v828_v21 = vadd.f32 %v812_v44, %v792_v8  ;;  %v498_v44 = vmul.f32 %v1862_v25, %v1981_v45  ;;  %v2112_v35 = vsel %vm419_vm3, %v739_v14, 0.0  ;;  %v778_v48 = vmul.f32 %v1906_v51, %v1969_v33  ;;  %v2162_v14 = vld [vmem:[%s1804_s21 + $0x58] sm:$0xff] }
  0xbb   : > { %901 = vst [vmem:[%s2023_s15 + $0x10] sm:$0xff] %v885_v19  ;;  %v692_v39 = vadd.f32 %v676_v58, %v656_v28  ;;  %v534_v49 = vmul.f32 %v1864_v26, %v2054_v24  ;;  %v657_v52 = vadd.f32 %v641_v29, %v621_v43  ;;  %v814_v53 = vmul.f32 %v1912_v55, %v2046_v42 }
  0xbc   : > { %v864_v30 = vadd.f32 %v848_v50, %v828_v21  ;;  %v459_v45 = vsel %vm443_vm1, %v438_v34, %v428_v38  ;;  %v709_v62 = vrot.slane %v2084_v20, 1  ;;  %v719_v33 = vrot.slane %v2094_v23, 1  ;;  %v2156_v21 = vld [vmem:[%s1804_s21 + $0x50] sm:$0xff] }
  0xbd   : > { %v793_v50 = vadd.f32 %v777_v11, %v692_v39  ;;  %v2125_v54 = vsel %vm416_vm0, %v459_v45, 0.0  ;;  %v550_v60 = vadd.f32 %v534_v49, %v498_v44  ;;  %v693_v6 = vadd.f32 %v677_v37, %v657_v52 }
  0xbe   : > { %v886_v46 = vadd.f32 %v1986_v47, %v864_v30  ;;  %v570_v3 = vmul.f32 %v1866_v27, %v2125_v54  ;;  %v606_v5 = vmul.f32 %v1875_v32, %v1933_v0  ;;  %v850_v13 = vmul.f32 %v1924_v59, %v2112_v35 }
  0xbf   : > { %v829_v63 = vadd.f32 %v813_v12, %v793_v50  ;;  %v642_v7 = vmul.f32 %v1885_v36, %v2010_v9  ;;  %v678_v8 = vmul.f32 %v1894_v41, %v2084_v20  ;;  %v499_v58 = vmul.f32 %v1862_v25, %v1996_v57 }
  0xc0   : > { %902 = vst [vmem:[%s2023_s15 + $0x18] sm:$0xff] %v886_v46  ;;  %v794_v17 = vadd.f32 %v778_v48, %v693_v6  ;;  %v586_v11 = vadd.f32 %v570_v3, %v550_v60  ;;  %v2143_v0 = vsel %vm443_vm1, %v428_v38, %v438_v34  ;;  %v2147_v56 = vsel %vm724_vm2, %v709_v62, %v719_v33 }
  0xc1   : > { %v865_v16 = vadd.f32 %v849_v31, %v829_v63  ;;  %v779_v61 = vmul.f32 %v1906_v51, %v2014_v10  ;;  %v535_v19 = vmul.f32 %v1864_v26, %v2069_v4  ;;  %v571_v57 = vmul.f32 %v1866_v27, %v2143_v0 }
  0xc2   : > { %v830_v28 = vadd.f32 %v814_v53, %v794_v17  ;;  %v622_v2 = vadd.f32 %v606_v5, %v586_v11  ;;  %v815_v29 = vmul.f32 %v1912_v55, %v2089_v22  ;;  %v851_v10 = vmul.f32 %v1924_v59, %v2147_v56 }
  0xc3   : > { %v887_v12 = vadd.f32 %v1986_v47, %v865_v16  ;;  %v551_v30 = vadd.f32 %v535_v19, %v499_v58  ;;  %v607_v31 = vmul.f32 %v1875_v32, %v1949_v15  ;;  %v643_v37 = vmul.f32 %v1885_v36, %v2019_v18 }
  0xc4   : > { %v866_v38 = vadd.f32 %v850_v13, %v830_v28  ;;  %v658_v39 = vadd.f32 %v642_v7, %v622_v2  ;;  %v740_v43 = vsel %vm724_vm2, %v719_v33, %v709_v62  ;;  %v429_v34 = vrot.slane %v2156_v21, 7 }
  0xc5   : > { %903 = vst [vmem:[%s2023_s15 + $0x20] sm:$0xff] %v887_v12  ;;  %v587_v44 = vadd.f32 %v571_v57, %v551_v30  ;;  %v679_v46 = vmul.f32 %v1894_v41, %v2094_v23  ;;  %v439_v48 = vrot.slane %v2162_v14, 7  ;;  %v500_v15 = vmul.f32 %v1862_v25, %v2054_v24 }
  0xc6   : > { %v888_v49 = vadd.f32 %v1986_v47, %v866_v38  ;;  %v694_v50 = vadd.f32 %v678_v8, %v658_v39  ;;  %v780_v52 = vmul.f32 %v1906_v51, %v2046_v42  ;;  %v536_v53 = vmul.f32 %v1864_v26, %v2125_v54  ;;  %v2227_v38 = vld [vmem:[%s1804_s21 + $0x68] sm:$0xff] }
  0xc7   : > { %v623_v45 = vadd.f32 %v607_v31, %v587_v44  ;;  %v2186_v60 = vsel %vm419_vm3, %v740_v43, 0.0  ;;  %v816_v62 = vmul.f32 %v1912_v55, %v2112_v35  ;;  %v460_v24 = vsel %vm443_vm1, %v439_v48, %v429_v34 }
  0xc8   : > { %904 = vst [vmem:[%s2023_s15 + $0x28] sm:$0xff] %v888_v49  ;;  %v795_v33 = vadd.f32 %v779_v61, %v694_v50  ;;  %v852_v63 = vmul.f32 %v1924_v59, %v2186_v60  ;;  %v2197_v42 = vsel %vm416_vm0, %v460_v24, 0.0  ;;  %v552_v6 = vadd.f32 %v536_v53, %v500_v15 }
  0xc9   : > { %v659_v3 = vadd.f32 %v643_v37, %v623_v45  ;;  %v572_v5 = vmul.f32 %v1866_v27, %v2197_v42  ;;  %v608_v13 = vmul.f32 %v1875_v32, %v2010_v9  ;;  %v644_v7 = vmul.f32 %v1885_v36, %v2084_v20  ;;  %v2224_v37 = vld [vmem:[%s1804_s21 + $0x60] sm:$0xff] }
  0xca   : > { %v831_v8 = vadd.f32 %v815_v29, %v795_v33  ;;  %v710_v58 = vrot.slane %v2156_v21, 1  ;;  %v720_v16 = vrot.slane %v2162_v14, 1  ;;  %v501_v17 = vmul.f32 %v1862_v25, %v2069_v4 }
  0xcb   : > { %v695_v11 = vadd.f32 %v679_v46, %v659_v3  ;;  %v588_v61 = vadd.f32 %v572_v5, %v552_v6  ;;  %v2211_v19 = vsel %vm443_vm1, %v429_v34, %v439_v48  ;;  %v537_v9 = vmul.f32 %v1864_v26, %v2143_v0 }
  0xcc   : > { %v867_v57 = vadd.f32 %v851_v10, %v831_v8  ;;  %v680_v12 = vmul.f32 %v1894_v41, %v2156_v21  ;;  %v781_v28 = vmul.f32 %v1906_v51, %v2089_v22  ;;  %v573_v4 = vmul.f32 %v1866_v27, %v2211_v19 }
  0xcd   : > { %v796_v2 = vadd.f32 %v780_v52, %v695_v11  ;;  %v624_v29 = vadd.f32 %v608_v13, %v588_v61  ;;  %v553_v30 = vadd.f32 %v537_v9, %v501_v17  ;;  %v609_v31 = vmul.f32 %v1875_v32, %v2019_v18 }
  0xce   : > { %v889_v10 = vadd.f32 %v1986_v47, %v867_v57  ;;  %v2232_v39 = vsel %vm724_vm2, %v710_v58, %v720_v16  ;;  %v817_v22 = vmul.f32 %v1912_v55, %v2147_v56  ;;  %v645_v43 = vmul.f32 %v1885_v36, %v2094_v23 }
  0xcf   : > { %v832_v34 = vadd.f32 %v816_v62, %v796_v2  ;;  %v660_v44 = vadd.f32 %v644_v7, %v624_v29  ;;  %v589_v46 = vadd.f32 %v573_v4, %v553_v30  ;;  %v741_v18 = vsel %vm724_vm2, %v720_v16, %v710_v58 }
  0xd0   : > { %905 = vst [vmem:[%s2023_s15 + $0x30] sm:$0xff] %v889_v10  ;;  %v853_v48 = vmul.f32 %v1924_v59, %v2232_v39  ;;  %v681_v15 = vmul.f32 %v1894_v41, %v2162_v14  ;;  %v430_v49 = vrot.slane %v2224_v37, 7  ;;  %v440_v50 = vrot.slane %v2227_v38, 7 }
  0xd1   : > { %v868_v52 = vadd.f32 %v852_v63, %v832_v34  ;;  %v696_v53 = vadd.f32 %v680_v12, %v660_v44  ;;  %v625_v45 = vadd.f32 %v609_v31, %v589_v46  ;;  %v502_v62 = vmul.f32 %v1862_v25, %v2125_v54  ;;  %v2294_v44 = vld [vmem:[%s1804_s21 + $0x70] sm:$0xff]  ;;  %v2297_v46 = vld [vmem:[%s1804_s21 + $0x78] sm:$0xff]  ;;  %s386_s21 = scvt.s32.f32 %s2318_s10 }
  0xd2   : > { %v2251_v24 = vsel %vm419_vm3, %v741_v18, 0.0  ;;  %v782_v33 = vmul.f32 %v1906_v51, %v2112_v35  ;;  %v461_v6 = vsel %vm443_vm1, %v440_v50, %v430_v49  ;;  %v538_v3 = vmul.f32 %v1864_v26, %v2197_v42 }
  0xd3   : > { %v890_v63 = vadd.f32 %v1986_v47, %v868_v52  ;;  %v797_v5 = vadd.f32 %v781_v28, %v696_v53  ;;  %v661_v13 = vadd.f32 %v645_v43, %v625_v45  ;;  %v2262_v54 = vsel %vm416_vm0, %v461_v6, 0.0 }
  0xd4   : > { %v818_v7 = vmul.f32 %v1912_v55, %v2186_v60  ;;  %v554_v8 = vadd.f32 %v538_v3, %v502_v62  ;;  %v574_v35 = vmul.f32 %v1866_v27, %v2262_v54  ;;  %v610_v58 = vmul.f32 %v1875_v32, %v2084_v20 }
  0xd5   : > { %906 = vst [vmem:[%s2023_s15 + $0x38] sm:$0xff] %v890_v63  ;;  %v833_v16 = vadd.f32 %v817_v22, %v797_v5  ;;  %v697_v17 = vadd.f32 %v681_v15, %v661_v13  ;;  %v854_v11 = vmul.f32 %v1924_v59, %v2251_v24  ;;  %v646_v61 = vmul.f32 %v1885_v36, %v2156_v21 }
  0xd6   : > { %v590_v9 = vadd.f32 %v574_v35, %v554_v8  ;;  %v711_v57 = vrot.slane %v2224_v37, 1  ;;  %v721_v12 = vrot.slane %v2227_v38, 1  ;;  %v503_v20 = vmul.f32 %v1862_v25, %v2143_v0 }
  0xd7   : > { %v869_v28 = vadd.f32 %v853_v48, %v833_v16  ;;  %v798_v4 = vadd.f32 %v782_v33, %v697_v17  ;;  %v2281_v2 = vsel %vm443_vm1, %v430_v49, %v440_v50  ;;  %v539_v29 = vmul.f32 %v1864_v26, %v2211_v19 }
  0xd8   : > { %v626_v30 = vadd.f32 %v610_v58, %v590_v9  ;;  %v682_v31 = vmul.f32 %v1894_v41, %v2224_v37  ;;  %v575_v10 = vmul.f32 %v1866_v27, %v2281_v2  ;;  %v611_v34 = vmul.f32 %v1875_v32, %v2094_v23 }
  0xd9   : > { %v891_v0 = vadd.f32 %v1986_v47, %v869_v28  ;;  %v834_v22 = vadd.f32 %v818_v7, %v798_v4  ;;  %v555_v43 = vadd.f32 %v539_v29, %v503_v20  ;;  %v2301_v48 = vsel %vm724_vm2, %v711_v57, %v721_v12 }
  0xda   : > { %v662_v18 = vadd.f32 %v646_v61, %v626_v30  ;;  %v783_v15 = vmul.f32 %v1906_v51, %v2147_v56  ;;  %v819_v49 = vmul.f32 %v1912_v55, %v2232_v39  ;;  %v647_v23 = vmul.f32 %v1885_v36, %v2162_v14 }
  0xdb   : > { %907 = vst [vmem:[%s2023_s15 + $0x40] sm:$0xff] %v891_v0  ;;  %v870_v50 = vadd.f32 %v854_v11, %v834_v22  ;;  %v591_v52 = vadd.f32 %v575_v10, %v555_v43  ;;  %v683_v53 = vmul.f32 %v1894_v41, %v2227_v38  ;;  %v742_v62 = vsel %vm724_vm2, %v721_v12, %v711_v57 }
  0xdc   : > { %v698_v45 = vadd.f32 %v682_v31, %v662_v18  ;;  %v431_v33 = vrot.slane %v2294_v44, 7  ;;  %v441_v56 = vrot.slane %v2297_v46, 7  ;;  %v504_v63 = vmul.f32 %v1862_v25, %v2197_v42 }
  0xdd   : > { %v892_v6 = vadd.f32 %v1986_v47, %v870_v50  ;;  %v627_v3 = vadd.f32 %v611_v34, %v591_v52  ;;  %v540_v5 = vmul.f32 %v1864_v26, %v2262_v54  ;;  %v855_v7 = vmul.f32 %v1924_v59, %v2301_v48 }
  0xde   : > { %v799_v13 = vadd.f32 %v783_v15, %v698_v45  ;;  %v784_v8 = vmul.f32 %v1906_v51, %v2186_v60  ;;  %v462_v35 = vsel %vm443_vm1, %v441_v56, %v431_v33  ;;  %v2334_v16 = vsel %vm419_vm3, %v742_v62, 0.0  ;;  %v392_v15 = vld [vmem:[%s334_s11] sm:$0xff] }
  0xdf   : > { %908 = vst [vmem:[%s2023_s15 + $0x48] sm:$0xff] %v892_v6  ;;  %v663_v58 = vadd.f32 %v647_v23, %v627_v3  ;;  %v484_v42 = vsel %vm416_vm0, %v462_v35, 0.0  ;;  %v556_v17 = vadd.f32 %v540_v5, %v504_v63  ;;  %v820_v61 = vmul.f32 %v1912_v55, %v2251_v24 }
  0xe0   : > { %v835_v11 = vadd.f32 %v819_v49, %v799_v13  ;;  %v576_v9 = vmul.f32 %v1866_v27, %v484_v42  ;;  %v612_v60 = vmul.f32 %v1875_v32, %v2156_v21  ;;  %v648_v12 = vmul.f32 %v1885_v36, %v2224_v37 }
  0xe1   : > { %v699_v57 = vadd.f32 %v683_v53, %v663_v58  ;;  %v712_v20 = vrot.slane %v2294_v44, 1  ;;  %v722_v28 = vrot.slane %v2297_v46, 1  ;;  %v452_v30 = vsel %vm443_vm1, %v431_v33, %v441_v56  ;;  %v393_v53 = vld [vmem:[%s334_s11 + $0x8] sm:$0xff] }
  0xe2   : > { %v871_v4 = vadd.f32 %v855_v7, %v835_v11  ;;  %v592_v29 = vadd.f32 %v576_v9, %v556_v17  ;;  %v505_v21 = vmul.f32 %v1862_v25, %v2211_v19  ;;  %v856_v10 = vmul.f32 %v1924_v59, %v2334_v16 }
  0xe3   : > { %v800_v31 = vadd.f32 %v784_v8, %v699_v57  ;;  %v541_v0 = vmul.f32 %v1864_v26, %v2281_v2  ;;  %v577_v22 = vmul.f32 %v1866_v27, %v452_v30  ;;  %v684_v18 = vmul.f32 %v1894_v41, %v2294_v44 }
  0xe4   : > { %v893_v43 = vadd.f32 %v1986_v47, %v871_v4  ;;  %v628_v34 = vadd.f32 %v612_v60, %v592_v29  ;;  %v394_v49 = vstv %s386_s21  ;;  %v785_v19 = vmul.f32 %v1906_v51, %v2232_v39 }
  0xe5   : > { %v836_v50 = vadd.f32 %v820_v61, %v800_v31  ;;  %v557_v52 = vadd.f32 %v541_v0, %v505_v21  ;;  %v613_v23 = vmul.f32 %v1875_v32, %v2162_v14  ;;  %v733_v62 = vsel %vm724_vm2, %v712_v20, %v722_v28 }
  0xe6   : > { %909 = vst [vmem:[%s2023_s15 + $0x50] sm:$0xff] %v893_v43  ;;  %v664_v45 = vadd.f32 %v648_v12, %v628_v34  ;;  %v821_v33 = vmul.f32 %v1912_v55, %v2301_v48  ;;  %v649_v56 = vmul.f32 %v1885_v36, %v2227_v38  ;;  %v743_v3 = vsel %vm724_vm2, %v722_v28, %v712_v20 }
  0xe7   : > { %v872_v6 = vadd.f32 %v856_v10, %v836_v50  ;;  %v593_v39 = vadd.f32 %v577_v22, %v557_v52  ;;  %v395_v14 = vmul.f32 %v394_v49, %v392_v15  ;;  %v396_v5 = vmul.f32 %v394_v49, %v393_v53 }
  0xe8   : > { %v700_v63 = vadd.f32 %v684_v18, %v664_v45  ;;  %v506_v13 = vmul.f32 %v1862_v25, %v2262_v54  ;;  %v542_v7 = vmul.f32 %v1864_v26, %v484_v42  ;;  %v685_v58 = vmul.f32 %v1894_v41, %v2297_v46 }
  0xe9   : > { %v894_v8 = vadd.f32 %v1986_v47, %v872_v6  ;;  %v629_v35 = vadd.f32 %v613_v23, %v593_v39  ;;  %v432_v17 = vrot.slane %v395_v14, 7  ;;  %v857_v61 = vmul.f32 %v1924_v59, %v733_v62 }
  0xea   : > { %v801_v11 = vadd.f32 %v785_v19, %v700_v63  ;;  %v442_v9 = vrot.slane %v396_v5, 7  ;;  %v766_v57 = vsel %vm419_vm3, %v743_v3, 0.0  ;;  %v786_v54 = vmul.f32 %v1906_v51, %v2251_v24 }
  0xeb   : > { %910 = vst [vmem:[%s2023_s15 + $0x58] sm:$0xff] %v894_v8  ;;  %v665_v60 = vadd.f32 %v649_v56, %v629_v35  ;;  %v822_v12 = vmul.f32 %v1912_v55, %v2334_v16  ;;  %v558_v28 = vadd.f32 %v542_v7, %v506_v13  ;;  %v858_v29 = vmul.f32 %v1924_v59, %v766_v57 }
  0xec   : > { %v837_v42 = vadd.f32 %v821_v33, %v801_v11  ;;  %v463_v20 = vsel %vm443_vm1, %v442_v9, %v432_v17  ;;  %v453_v31 = vsel %vm443_vm1, %v432_v17, %v442_v9  ;;  %v614_v0 = vmul.f32 %v1875_v32, %v2224_v37 }
  0xed   : > { %v701_v4 = vadd.f32 %v685_v58, %v665_v60  ;;  %v486_v21 = vsel %vm416_vm0, %v463_v20, 0.0  ;;  %v507_v22 = vmul.f32 %v1862_v25, %v2281_v2  ;;  %v650_v34 = vmul.f32 %v1885_v36, %v2294_v44 }
  0xee   : > { %v873_v10 = vadd.f32 %v857_v61, %v837_v42  ;;  %v578_v24 = vmul.f32 %v1866_v27, %v486_v21  ;;  %v543_v18 = vmul.f32 %v1864_v26, %v452_v30  ;;  %v579_v15 = vmul.f32 %v1866_v27, %v453_v31 }
  0xef   : > { %v802_v43 = vadd.f32 %v786_v54, %v701_v4  ;;  %v713_v19 = vrot.slane %v395_v14, 1  ;;  %v723_v52 = vrot.slane %v396_v5, 1  ;;  %v615_v37 = vmul.f32 %v1875_v32, %v2227_v38 }
  0xf0   : > { %v895_v49 = vadd.f32 %v1986_v47, %v873_v10  ;;  %v594_v50 = vadd.f32 %v578_v24, %v558_v28  ;;  %v559_v53 = vadd.f32 %v543_v18, %v507_v22  ;;  %v686_v2 = vmul.f32 %v1894_v41, %v395_v14 }
  0xf1   : > { %v838_v23 = vadd.f32 %v822_v12, %v802_v43  ;;  %v651_v27 = vmul.f32 %v1885_v36, %v2297_v46  ;;  %v734_v45 = vsel %vm724_vm2, %v713_v19, %v723_v52  ;;  %v787_v33 = vmul.f32 %v1906_v51, %v2301_v48 }
  0xf2   : > { %911 = vst [vmem:[%s2023_s15 + $0x60] sm:$0xff] %v895_v49  ;;  %v630_v25 = vadd.f32 %v614_v0, %v594_v50  ;;  %v595_v26 = vadd.f32 %v579_v15, %v559_v53  ;;  %v687_v56 = vmul.f32 %v1894_v41, %v396_v5  ;;  %v744_v6 = vsel %vm724_vm2, %v723_v52, %v713_v19 }
  0xf3   : > { %v874_v44 = vadd.f32 %v858_v29, %v838_v23  ;;  %v823_v3 = vmul.f32 %v1912_v55, %v733_v62  ;;  %v788_v46 = vmul.f32 %v1906_v51, %v2334_v16  ;;  %v859_v14 = vmul.f32 %v1924_v59, %v734_v45 }
  0xf4   : > { %v666_v30 = vadd.f32 %v650_v34, %v630_v25  ;;  %v631_v38 = vadd.f32 %v615_v37, %v595_v26  ;;  %v768_v41 = vsel %vm419_vm3, %v744_v6, 0.0  ;;  %v824_v63 = vmul.f32 %v1912_v55, %v766_v57 }
  0xf5   : > { %v896_v32 = vadd.f32 %v1986_v47, %v874_v44  ;;  %v860_v51 = vmul.f32 %v1924_v59, %v768_v41 }
  0xf6   : > { %v702_v39 = vadd.f32 %v686_v2, %v666_v30  ;;  %v667_v36 = vadd.f32 %v651_v27, %v631_v38 }
  0xf7   : > { %912 = vst [vmem:[%s2023_s15 + $0x68] sm:$0xff] %v896_v32 }
  0xf8   : > { %v803_v48 = vadd.f32 %v787_v33, %v702_v39  ;;  %v703_v1 = vadd.f32 %v687_v56, %v667_v36 }
  0xfa   : > { %v839_v62 = vadd.f32 %v823_v3, %v803_v48  ;;  %v804_v5 = vadd.f32 %v788_v46, %v703_v1 }
  0xfc   : > { %v875_v16 = vadd.f32 %v859_v14, %v839_v62  ;;  %v840_v13 = vadd.f32 %v824_v63, %v804_v5 }
  0xfe   : > { %v897_v7 = vadd.f32 %v1986_v47, %v875_v16  ;;  %v876_v8 = vadd.f32 %v860_v51, %v840_v13 }
 0x100   : > { %913 = vst [vmem:[%s2023_s15 + $0x70] sm:$0xff] %v897_v7  ;;  %v898_v40 = vadd.f32 %v1986_v47, %v876_v8 }
 0x102   : > { %914 = vst [vmem:[%s2023_s15 + $0x78] sm:$0xff] %v898_v40 }
 0x103   : > { %1356 = shalt.err (!%p1353_p6)
}
 0x104   : > { %s1357_s30 = scalar_lea.hbm %s2439_s3, 2048  ;;  %s1361_s15 = scalar_lea.hbm %s2599_s7, 8192 }
 0x105   : > { %p1358_p10 = scmp.ne.s32.totalorder %s2439_s3, %s1357_s30  ;;  %p1362_p2 = scmp.lt.s32.totalorder %s2439_s3, %s2599_s7 }
 0x106   : > { %p1363_p4 = scmp.lt.s32.totalorder %s1361_s15, %s1357_s30 }
 0x107   : > { %p1359_p13 = pnand %p1358_p10, %p2600_p7 }
 0x108   : > { %p1364_p11 = por %p1363_p4, %p1362_p2 }
 0x109   : > { %p1360_p0 = pneg %p1359_p13 }
 0x10b   : > { %p1365_p12 = pnand %p1364_p11, %p1360_p0 }
 0x10d   : > { %1368 = shalt.err (!%p1365_p12)
}
 0x10e   : > { %s1503_s14 = smov 128   ;;  %s1504_s12 = smov 8  }
 0x10f   : > { %1125 = dma.vmem_to_hbm [thread:$0]  (%p2600_p7), %s2441_s27, 2048, %s2439_s3, %s916_s13, %s1503_s14, %s1503_s14, %s1504_s12  }
 0x110 PF: > { %p1142_p9 = scmp.ge.s32.totalorder %s1495_s6, 2  ;;  %s947_s22 = sand.u32 1, %s1467_s24  }
 0x111   : > { %p2601_p3 = scmp.ne.s32.totalorder %s2576_s17, 0  ;;  %s948_s4 = scalar_lea.sflag [#allocation4], %s947_s22 }
 0x113   : > { %p1138_p1 = pnand %p1142_p9, %p2601_p3 }
 0x115   : > { %p1139_p8 = pneg %p1138_p1 }
 0x117   : > { %1438 = dma.done.wait (%p1139_p8), %s948_s4, 2048  }
 0x118   : > { %1440 = vsyncadd (%p1139_p8), %s948_s4, 4294965248  ;;  %s24_s6 = sadd.s32 1, %s1495_s6   ;;  %s2603_s21 = sld [smem:[#allocation13_spill]] }
 0x119   : > { %p2473_p5 = scmp.ge.s32.totalorder %s24_s6, 6   ;;  %s2604_s22 = sld [smem:[#allocation14_spill]] }
 0x11a   : > { %s2605_s23 = sld [smem:[#allocation24_spill]]  ;;  %s2613_s18 = smov %s1447_s19 }
 0x11b   : > { %s2606_s16 = sld [smem:[#allocation15_spill]]  ;;  %s2614_s19 = smov %s1451_s20 }
 0x11c   : > { %s2607_s26 = sld [smem:[#allocation25_spill]]  ;;  %s2615_s20 = smov %s1773_s5 }
 0x11d   : > { %s2608_s27 = sld [smem:[#allocation18_spill]]  ;;  %s2616_s24 = smov %s1471_s25 }
 0x11e   : > { %s2609_s28 = sld [smem:[#allocation19_spill]]  ;;  %23 = sbr.rel (!%p2473_p5) target bundleno = 19 (0x13), region = 109 }
 0x11f   : > { %s2610_s29 = sld [smem:[#allocation20_spill]] }
 0x120   : > { %s2611_s30 = sld [smem:[#allocation21_spill]] }
 0x121   : > { %s2617_s25 = smov %s2606_s16 }
 0x123   :  { %953 = vsyncpa [#allocation3], 1 }
 0x124   :  { %955 = vsyncpa [#allocation3 + $0x1], 1 }
 0x125   :  { %956 = vsyncpa [#allocation6], 1 }
 0x126   :  { %958 = vsyncpa [#allocation6 + $0x1], 1 }
 0x127   :  { %959 = vsyncpa [#allocation4], 1 }
 0x128   :  { %961 = vsyncpa [#allocation4 + $0x1], 1 }

</bundles_post_ra>
